<compile_context>
chip_gen: v7x
topology: tpu7x:2x2x1
jax: 0.10.0
libtpu: 0.0.40
codegen_flags: <defaults>
</compile_context>

<pallas_src>
import numpy as np
import jax
import jax.numpy as jnp
from jax.experimental import pallas as pl
from jax.experimental.pallas import tpu as pltpu

SIZE_LAYER = 128      # size_layer in the PyTorch module
THREE_LAYERS = False  # matches the module's global
IN_PAD = 128          # ragged RNN input width (obs+act+1) padded to one lane tile


def weight_init(key, shape):
    """Matches torch weight_init: randn(size) * sqrt(2/(size[0]+size[1]))."""
    scale = np.sqrt(2.0 / (shape[0] + shape[1]))
    return jax.random.normal(key, shape, dtype=jnp.float32) * jnp.float32(scale)


def make_params(key, observation_dim, action_dim):
    H = SIZE_LAYER
    in_dim = observation_dim + action_dim + 1
    ks = jax.random.split(key, 10)
    bound = 1.0 / np.sqrt(H)
    return {
        # RNNCell: weight_ih (H, in), weight_hh (H, H) -- re-initialized via weight_init
        "wih": weight_init(ks[0], (H, in_dim)),
        "whh": weight_init(ks[1], (H, H)),
        # RNNCell biases keep torch default uniform(-1/sqrt(H), 1/sqrt(H))
        "bih": jax.random.uniform(ks[2], (H,), jnp.float32, -bound, bound),
        "bhh": jax.random.uniform(ks[3], (H,), jnp.float32, -bound, bound),
        # Linear layers: weight (out, in) via weight_init, bias default uniform
        "w1": weight_init(ks[4], (H, H)),
        "b1": jax.random.uniform(ks[5], (H,), jnp.float32, -bound, bound),
        "w2": weight_init(ks[6], (H, H)),
        "b2": jax.random.uniform(ks[7], (H,), jnp.float32, -bound, bound),
        "wo": weight_init(ks[8], (action_dim, H)),
        "bo": jax.random.uniform(ks[9], (action_dim,), jnp.float32, -bound, bound),
    }


def prepare_params(params, action_dim):
    """One-time preprocessing, hoisted out of the per-call hot path:
      - fuse ih/hh weights into one (256,128) matrix (input rows zero-padded to 128),
        pre-sum bih+bhh into one bias
      - pre-transpose linear weights to [in, out]
      - zero-pad the output layer to 128 lanes (lane-dense output stores)
      - cast matmul weights to bf16 (MXU operands); biases stay f32
    """
    H = SIZE_LAYER
    in_dim = params["wih"].shape[1]

    w_rnn = jnp.zeros((IN_PAD + H, H), jnp.float32)
    w_rnn = w_rnn.at[:in_dim, :].set(params["wih"].T)
    w_rnn = w_rnn.at[IN_PAD:, :].set(params["whh"].T)
    b_rnn = (params["bih"] + params["bhh"]).reshape(1, H)

    wo_pad = jnp.zeros((H, IN_PAD), jnp.float32).at[:, :action_dim].set(params["wo"].T)
    bo_pad = jnp.zeros((1, IN_PAD), jnp.float32).at[:, :action_dim].set(
        params["bo"].reshape(1, -1))

    return {
        "w_rnn": w_rnn.astype(jnp.bfloat16),
        "b_rnn": b_rnn,
        "w1": params["w1"].T.astype(jnp.bfloat16),
        "b1": params["b1"].reshape(1, H),
        "w2": params["w2"].T.astype(jnp.bfloat16),
        "b2": params["b2"].reshape(1, H),
        "wo": wo_pad.astype(jnp.bfloat16),
        "bo": bo_pad,
    }


def _actor_kernel(x_ref, h_ref,
                  wr_ref, br_ref,
                  w1_ref, b1_ref, w2_ref, b2_ref,
                  wo_ref, bo_ref,
                  out_ref, hnew_ref):
    # Fused RNNCell: single (BM,256)@(256,128) matmul; bias pre-summed in wrapper.
    xh = jnp.concatenate([x_ref[...], h_ref[...]], axis=-1).astype(jnp.bfloat16)
    pre = jnp.dot(xh, wr_ref[...], preferred_element_type=jnp.float32) + br_ref[...]
    h_new = jnp.tanh(pre)  # elementwise kept in f32 (v5e has no bf16 VPU/EUP)

    # hidden_layer1 + ReLU
    x = jnp.dot(h_new.astype(jnp.bfloat16), w1_ref[...],
                preferred_element_type=jnp.float32) + b1_ref[...]
    x = jnp.maximum(x, 0.0)

    # hidden_layer2 + ReLU
    x = jnp.dot(x.astype(jnp.bfloat16), w2_ref[...],
                preferred_element_type=jnp.float32) + b2_ref[...]
    x = jnp.maximum(x, 0.0)

    # TODO(synk): three_layers=False in the reference module; hidden_layer3 omitted.

    # output_layer, padded to 128 lanes -> unmasked lane-dense stores.
    out_ref[...] = jnp.dot(x.astype(jnp.bfloat16), wo_ref[...],
                           preferred_element_type=jnp.float32) + bo_ref[...]
    hnew_ref[...] = h_new


def _round_up(x, m):
    return ((x + m - 1) // m) * m


def actor_forward(inputs, h_actor, prep, action_dim):
    """inputs: (B, obs+act+1) f32, h_actor: (B, 128) f32, prep from prepare_params.
    Returns ((B, action_dim), (B, 128))."""
    B, in_dim = inputs.shape
    H = SIZE_LAYER

    BM = min(128, _round_up(B, 8))   # sublane-aligned batch tile
    B_pad = _round_up(B, BM)
    grid = (B_pad // BM,)

    # The only per-call data prep: pad the ragged input width to 128 lanes (zero
    # pads are inert against the zero-padded rows of w_rnn) and, if needed, pad
    # the batch to a whole number of tiles.
    x_p = jnp.zeros((B_pad, IN_PAD), jnp.float32).at[:B, :in_dim].set(inputs)
    if B_pad == B:
        h_p = h_actor
    else:
        h_p = jnp.zeros((B_pad, H), jnp.float32).at[:B, :].set(h_actor)

    def const_spec(a):
        return pl.BlockSpec(a.shape, lambda i: (0,) * a.ndim)

    args = (x_p, h_p, prep["w_rnn"], prep["b_rnn"], prep["w1"], prep["b1"],
            prep["w2"], prep["b2"], prep["wo"], prep["bo"])

    # TODO(synk): for a per-timestep rollout, fuse the time loop as an extra
    # "arbitrary" grid axis with h carried in VMEM scratch (and alias h via
    # input_output_aliases); not needed for this single-step forward.
    out_p, h_new_p = pl.pallas_call(
        _actor_kernel,
        grid=grid,
        in_specs=[pl.BlockSpec((BM, IN_PAD), lambda i: (i, 0)),
                  pl.BlockSpec((BM, H), lambda i: (i, 0))]
                 + [const_spec(a) for a in args[2:]],
        out_specs=(pl.BlockSpec((BM, IN_PAD), lambda i: (i, 0)),
                   pl.BlockSpec((BM, H), lambda i: (i, 0))),
        out_shape=(jax.ShapeDtypeStruct((B_pad, IN_PAD), jnp.float32),
                   jax.ShapeDtypeStruct((B_pad, H), jnp.float32)),
        compiler_params=pltpu.CompilerParams(
            dimension_semantics=("parallel",)),  # uses both v7x TCs when B is large
    )(*args)

    return out_p[:B, :action_dim], h_new_p[:B, :]


def actor_forward_ref(inputs, h_actor, params):
    """Pure-JAX (f32) reference mirroring the PyTorch forward."""
    h_new = jnp.tanh(inputs @ params["wih"].T + params["bih"]
                     + h_actor @ params["whh"].T + params["bhh"])
    x = jax.nn.relu(h_new @ params["w1"].T + params["b1"])
    x = jax.nn.relu(x @ params["w2"].T + params["b2"])
    out = x @ params["wo"].T + params["bo"]
    return out, h_new


if __name__ == "__main__":
    observation_dim = 16
    action_dim = 4
    batch = 8
    in_dim = observation_dim + action_dim + 1  # 21

    key = jax.random.PRNGKey(0)
    kp, kx, kh = jax.random.split(key, 3)
    params = make_params(kp, observation_dim, action_dim)
    prep = prepare_params(params, action_dim)   # one-time; not in the hot path

    inputs = jax.random.normal(kx, (batch, in_dim), dtype=jnp.float32)
    h_actor = jnp.zeros((batch, SIZE_LAYER), dtype=jnp.float32)  # init_hidden_state

    out, h_new = actor_forward(inputs, h_actor, prep, action_dim)
    out = jax.block_until_ready(out)
    h_new = jax.block_until_ready(h_new)

    out_ref, h_ref = actor_forward_ref(inputs, h_actor, params)
    # Tolerance loosened vs. pure-f32 because matmul operands are bf16 (f32 accum).
    np.testing.assert_allclose(np.asarray(out), np.asarray(out_ref), rtol=5e-2, atol=5e-2)
    np.testing.assert_allclose(np.asarray(h_new), np.asarray(h_ref), rtol=5e-2, atol=5e-2)

    print("KERNEL_OK")
</pallas_src>

<mosaic_0001>
module attributes {stable_mosaic.version = 11 : i64} {
  func.func @_actor_kernel(%arg0: i32, %arg1: memref<8x128xf32, #tpu.memory_space<vmem>>, %arg2: memref<8x128xf32, #tpu.memory_space<vmem>>, %arg3: memref<256x128xbf16, #tpu.memory_space<vmem>>, %arg4: memref<1x128xf32, #tpu.memory_space<vmem>>, %arg5: memref<128x128xbf16, #tpu.memory_space<vmem>>, %arg6: memref<1x128xf32, #tpu.memory_space<vmem>>, %arg7: memref<128x128xbf16, #tpu.memory_space<vmem>>, %arg8: memref<1x128xf32, #tpu.memory_space<vmem>>, %arg9: memref<128x128xbf16, #tpu.memory_space<vmem>>, %arg10: memref<1x128xf32, #tpu.memory_space<vmem>>, %arg11: memref<8x128xf32, #tpu.memory_space<vmem>>, %arg12: memref<8x128xf32, #tpu.memory_space<vmem>>) attributes {dimension_semantics = [#tpu.dimension_semantics<parallel>], iteration_bounds = array<i64: 1>, scalar_prefetch = 0 : i64, scratch_operands = 0 : i64, tpu.core_type = #tpu.core_type<tc>, window_params = [{transform_indices = @transform_0, window_bounds = array<i64: 8, 128>}, {transform_indices = @transform_1, window_bounds = array<i64: 8, 128>}, {pipeline_mode = #tpu.pipeline_mode<synchronous>, transform_indices = @transform_2, window_bounds = array<i64: 256, 128>}, {pipeline_mode = #tpu.pipeline_mode<synchronous>, transform_indices = @transform_3, window_bounds = array<i64: 1, 128>}, {pipeline_mode = #tpu.pipeline_mode<synchronous>, transform_indices = @transform_4, window_bounds = array<i64: 128, 128>}, {pipeline_mode = #tpu.pipeline_mode<synchronous>, transform_indices = @transform_5, window_bounds = array<i64: 1, 128>}, {pipeline_mode = #tpu.pipeline_mode<synchronous>, transform_indices = @transform_6, window_bounds = array<i64: 128, 128>}, {pipeline_mode = #tpu.pipeline_mode<synchronous>, transform_indices = @transform_7, window_bounds = array<i64: 1, 128>}, {pipeline_mode = #tpu.pipeline_mode<synchronous>, transform_indices = @transform_8, window_bounds = array<i64: 128, 128>}, {pipeline_mode = #tpu.pipeline_mode<synchronous>, transform_indices = @transform_9, window_bounds = array<i64: 1, 128>}, {transform_indices = @transform_10, window_bounds = array<i64: 8, 128>}, {transform_indices = @transform_11, window_bounds = array<i64: 8, 128>}]} {
    %c0 = arith.constant 0 : index
    %c0_0 = arith.constant 0 : index
    %0 = vector.load %arg1[%c0, %c0_0] : memref<8x128xf32, #tpu.memory_space<vmem>>, vector<8x128xf32>
    %c0_1 = arith.constant 0 : index
    %c0_2 = arith.constant 0 : index
    %1 = vector.load %arg2[%c0_1, %c0_2] : memref<8x128xf32, #tpu.memory_space<vmem>>, vector<8x128xf32>
    %2 = tpu.concatenate %0, %1 in 1 : vector<8x128xf32>, vector<8x128xf32> -> vector<8x256xf32>
    %3 = arith.truncf %2 : vector<8x256xf32> to vector<8x256xbf16>
    %c0_3 = arith.constant 0 : index
    %c0_4 = arith.constant 0 : index
    %4 = vector.load %arg3[%c0_3, %c0_4] : memref<256x128xbf16, #tpu.memory_space<vmem>>, vector<256x128xbf16>
    %cst = arith.constant dense<0.000000e+00> : vector<8x128xf32>
    %5 = tpu.matmul %3, %4, %cst {dimension_numbers = #tpu.dot_dimension_numbers<[1], [0], [0], [1], [0, 0, 1, 1], [], []>} : vector<8x256xbf16>, vector<256x128xbf16>, vector<8x128xf32> -> vector<8x128xf32>
    %c0_5 = arith.constant 0 : index
    %c0_6 = arith.constant 0 : index
    %6 = vector.load %arg4[%c0_5, %c0_6] : memref<1x128xf32, #tpu.memory_space<vmem>>, vector<1x128xf32>
    %7 = vector.broadcast %6 : vector<1x128xf32> to vector<8x128xf32>
    %8 = arith.addf %5, %7 : vector<8x128xf32>
    %9 = math.tanh %8 : vector<8x128xf32>
    %10 = arith.truncf %9 : vector<8x128xf32> to vector<8x128xbf16>
    %c0_7 = arith.constant 0 : index
    %c0_8 = arith.constant 0 : index
    %11 = vector.load %arg5[%c0_7, %c0_8] : memref<128x128xbf16, #tpu.memory_space<vmem>>, vector<128x128xbf16>
    %cst_9 = arith.constant dense<0.000000e+00> : vector<8x128xf32>
    %12 = tpu.matmul %10, %11, %cst_9 {dimension_numbers = #tpu.dot_dimension_numbers<[1], [0], [0], [1], [0, 0, 1, 1], [], []>} : vector<8x128xbf16>, vector<128x128xbf16>, vector<8x128xf32> -> vector<8x128xf32>
    %c0_10 = arith.constant 0 : index
    %c0_11 = arith.constant 0 : index
    %13 = vector.load %arg6[%c0_10, %c0_11] : memref<1x128xf32, #tpu.memory_space<vmem>>, vector<1x128xf32>
    %14 = vector.broadcast %13 : vector<1x128xf32> to vector<8x128xf32>
    %15 = arith.addf %12, %14 : vector<8x128xf32>
    %cst_12 = arith.constant 0.000000e+00 : f32
    %16 = vector.broadcast %cst_12 : f32 to vector<8x128xf32>
    %17 = arith.maximumf %15, %16 : vector<8x128xf32>
    %18 = arith.truncf %17 : vector<8x128xf32> to vector<8x128xbf16>
    %c0_13 = arith.constant 0 : index
    %c0_14 = arith.constant 0 : index
    %19 = vector.load %arg7[%c0_13, %c0_14] : memref<128x128xbf16, #tpu.memory_space<vmem>>, vector<128x128xbf16>
    %cst_15 = arith.constant dense<0.000000e+00> : vector<8x128xf32>
    %20 = tpu.matmul %18, %19, %cst_15 {dimension_numbers = #tpu.dot_dimension_numbers<[1], [0], [0], [1], [0, 0, 1, 1], [], []>} : vector<8x128xbf16>, vector<128x128xbf16>, vector<8x128xf32> -> vector<8x128xf32>
    %c0_16 = arith.constant 0 : index
    %c0_17 = arith.constant 0 : index
    %21 = vector.load %arg8[%c0_16, %c0_17] : memref<1x128xf32, #tpu.memory_space<vmem>>, vector<1x128xf32>
    %22 = vector.broadcast %21 : vector<1x128xf32> to vector<8x128xf32>
    %23 = arith.addf %20, %22 : vector<8x128xf32>
    %cst_18 = arith.constant 0.000000e+00 : f32
    %24 = vector.broadcast %cst_18 : f32 to vector<8x128xf32>
    %25 = arith.maximumf %23, %24 : vector<8x128xf32>
    %26 = arith.truncf %25 : vector<8x128xf32> to vector<8x128xbf16>
    %c0_19 = arith.constant 0 : index
    %c0_20 = arith.constant 0 : index
    %27 = vector.load %arg9[%c0_19, %c0_20] : memref<128x128xbf16, #tpu.memory_space<vmem>>, vector<128x128xbf16>
    %cst_21 = arith.constant dense<0.000000e+00> : vector<8x128xf32>
    %28 = tpu.matmul %26, %27, %cst_21 {dimension_numbers = #tpu.dot_dimension_numbers<[1], [0], [0], [1], [0, 0, 1, 1], [], []>} : vector<8x128xbf16>, vector<128x128xbf16>, vector<8x128xf32> -> vector<8x128xf32>
    %c0_22 = arith.constant 0 : index
    %c0_23 = arith.constant 0 : index
    %29 = vector.load %arg10[%c0_22, %c0_23] : memref<1x128xf32, #tpu.memory_space<vmem>>, vector<1x128xf32>
    %30 = vector.broadcast %29 : vector<1x128xf32> to vector<8x128xf32>
    %31 = arith.addf %28, %30 : vector<8x128xf32>
    %c0_24 = arith.constant 0 : index
    %c0_25 = arith.constant 0 : index
    %32 = vector.load %arg11[%c0_24, %c0_25] : memref<8x128xf32, #tpu.memory_space<vmem>>, vector<8x128xf32>
    tpu.vector_store %arg11[%c0_24, %c0_25], %31 {strides = array<i32>} : memref<8x128xf32, #tpu.memory_space<vmem>>, vector<8x128xf32>,
    %c0_26 = arith.constant 0 : index
    %c0_27 = arith.constant 0 : index
    %33 = vector.load %arg12[%c0_26, %c0_27] : memref<8x128xf32, #tpu.memory_space<vmem>>, vector<8x128xf32>
    tpu.vector_store %arg12[%c0_26, %c0_27], %9 {strides = array<i32>} : memref<8x128xf32, #tpu.memory_space<vmem>>, vector<8x128xf32>,
    return
  }
  func.func @transform_0(%arg0: i32) -> (i32, i32) {
    %c0_i32 = arith.constant 0 : i32
    %c0_i32_0 = arith.constant 0 : i32
    return %arg0, %c0_i32 : i32, i32
  }
  func.func @transform_1(%arg0: i32) -> (i32, i32) {
    %c0_i32 = arith.constant 0 : i32
    %c0_i32_0 = arith.constant 0 : i32
    return %arg0, %c0_i32 : i32, i32
  }
  func.func @transform_2(%arg0: i32) -> (i32, i32) {
    %c0_i32 = arith.constant 0 : i32
    %c0_i32_0 = arith.constant 0 : i32
    %c0_i32_1 = arith.constant 0 : i32
    return %c0_i32, %c0_i32_0 : i32, i32
  }
  func.func @transform_3(%arg0: i32) -> (i32, i32) {
    %c0_i32 = arith.constant 0 : i32
    %c0_i32_0 = arith.constant 0 : i32
    %c0_i32_1 = arith.constant 0 : i32
    return %c0_i32, %c0_i32_0 : i32, i32
  }
  func.func @transform_4(%arg0: i32) -> (i32, i32) {
    %c0_i32 = arith.constant 0 : i32
    %c0_i32_0 = arith.constant 0 : i32
    %c0_i32_1 = arith.constant 0 : i32
    return %c0_i32, %c0_i32_0 : i32, i32
  }
  func.func @transform_5(%arg0: i32) -> (i32, i32) {
    %c0_i32 = arith.constant 0 : i32
    %c0_i32_0 = arith.constant 0 : i32
    %c0_i32_1 = arith.constant 0 : i32
    return %c0_i32, %c0_i32_0 : i32, i32
  }
  func.func @transform_6(%arg0: i32) -> (i32, i32) {
    %c0_i32 = arith.constant 0 : i32
    %c0_i32_0 = arith.constant 0 : i32
    %c0_i32_1 = arith.constant 0 : i32
    return %c0_i32, %c0_i32_0 : i32, i32
  }
  func.func @transform_7(%arg0: i32) -> (i32, i32) {
    %c0_i32 = arith.constant 0 : i32
    %c0_i32_0 = arith.constant 0 : i32
    %c0_i32_1 = arith.constant 0 : i32
    return %c0_i32, %c0_i32_0 : i32, i32
  }
  func.func @transform_8(%arg0: i32) -> (i32, i32) {
    %c0_i32 = arith.constant 0 : i32
    %c0_i32_0 = arith.constant 0 : i32
    %c0_i32_1 = arith.constant 0 : i32
    return %c0_i32, %c0_i32_0 : i32, i32
  }
  func.func @transform_9(%arg0: i32) -> (i32, i32) {
    %c0_i32 = arith.constant 0 : i32
    %c0_i32_0 = arith.constant 0 : i32
    %c0_i32_1 = arith.constant 0 : i32
    return %c0_i32, %c0_i32_0 : i32, i32
  }
  func.func @transform_10(%arg0: i32) -> (i32, i32) {
    %c0_i32 = arith.constant 0 : i32
    %c0_i32_0 = arith.constant 0 : i32
    return %arg0, %c0_i32 : i32, i32
  }
  func.func @transform_11(%arg0: i32) -> (i32, i32) {
    %c0_i32 = arith.constant 0 : i32
    %c0_i32_0 = arith.constant 0 : i32
    return %arg0, %c0_i32 : i32, i32
  }
}

</mosaic_0001>

<bundles_post_ra>
// kernel: tpu_custom_call.1
= control target key start
LH: loop header
LB: loop body
LE: loop exit
PB: predicated region body
PF: predicated region fallthrough
CT: control target
= control target key end

     0   :  { %17 = vsyncpa [#allocation3], 0  ;;  %s1287_s0 = inlined_call_operand.hbm [shape: f32[8,128], index: 0, kind: input, shape index: {}]   ;;  %s1288_s1 = inlined_call_operand.hbm [shape: f32[8,128], index: 1, kind: input, shape index: {}]   ;;  %s1289_s2 = inlined_call_operand.hbm [shape: bf16[256,128], index: 2, kind: input, shape index: {}]   ;;  %s1290_s3 = inlined_call_operand.vmem [shape: f32[1,128], index: 3, kind: input, shape index: {}]   ;;  %s1291_s4 = inlined_call_operand.hbm [shape: bf16[128,128], index: 4, kind: input, shape index: {}]   ;;  %s1292_s5 = inlined_call_operand.vmem [shape: f32[1,128], index: 5, kind: input, shape index: {}]   ;;  %s1293_s6 = inlined_call_operand.hbm [shape: bf16[128,128], index: 6, kind: input, shape index: {}]   ;;  %s1294_s7 = inlined_call_operand.vmem [shape: f32[1,128], index: 7, kind: input, shape index: {}]   ;;  %s1295_s8 = inlined_call_operand.hbm [shape: bf16[128,128], index: 8, kind: input, shape index: {}]   ;;  %s1296_s9 = inlined_call_operand.vmem [shape: f32[1,128], index: 9, kind: input, shape index: {}]   ;;  %s1297_s10 = inlined_call_operand.hbm [shape: f32[8,128], index: 10, kind: output, shape index: {0}]   ;;  %s1298_s11 = inlined_call_operand.hbm [shape: f32[8,128], index: 11, kind: output, shape index: {1}]  }
   0x1   :  { %18 = vsyncpa [#allocation6], 0 }
   0x2   :  { %19 = vsyncpa [#allocation9], 0 }
   0x3   :  { %20 = vsyncpa [#allocation12], 0 }
   0x4   :  { %21 = vsyncpa [#allocation4], 0 }
   0x5   :  { %22 = vsyncpa [#allocation15], 0  ;;  %s1065_s17 = smov [#allocation5]   ;;  %s877_s21 = scalar_lea.hbm %s1288_s1, 128 }
   0x6   :  { %s39_s18 = sshll.u32 %s1065_s17, 4  ;;  %p878_p0 = scmp.ne.s32.totalorder %s1288_s1, %s877_s21  ;;  %s40_s18 = int_to_ptr.vmem [resolvable:$true] %s39_s18 }
   0x7   :  { %p881_p1 = scmp.lt.u32.totalorder %s877_s21, %s1288_s1 }
   0x9   :  { %p883_p2 = pnand %p881_p1, %p878_p0 }
   0xb   :  { %886 = shalt.err (!%p883_p2)
}
   0xc   :  { %s887_s26 = scalar_lea.vmem %s40_s18, 128  ;;  %p892_p4 = scmp.lt.s32.totalorder %s40_s18, %s40_s18 }
   0xd   :  { %p888_p3 = scmp.ne.s32.totalorder %s40_s18, %s887_s26  ;;  %p893_p5 = scmp.lt.s32.totalorder %s887_s26, %s887_s26 }
   0xf   :  { %p894_p6 = por %p893_p5, %p892_p4 }
  0x11   :  { %p895_p7 = pnand %p894_p6, %p888_p3 }
  0x13   :  { %898 = shalt.err (!%p895_p7)
}
  0x14   :  { %42 = dma.hbm_to_vmem [thread:$0]  %s1288_s1, 128, %s40_s18, [#allocation6]  }
  0x15   :  { %s1066_s29 = smov [#allocation8]   ;;  %s1067_s12 = smov [#allocation2]  }
  0x16   :  { %s62_s30 = sshll.u32 %s1066_s29, 4  ;;  %s29_s13 = sshll.u32 %s1067_s12, 4  ;;  %s63_s30 = int_to_ptr.vmem [resolvable:$true] %s62_s30  ;;  %s30_s13 = int_to_ptr.vmem [resolvable:$true] %s29_s13 }
  0x17   :  { %s899_s16 = scalar_lea.hbm %s1291_s4, 1024 }
  0x18   :  { %p900_p8 = scmp.ne.s32.totalorder %s1291_s4, %s899_s16  ;;  %p903_p9 = scmp.lt.u32.totalorder %s899_s16, %s1291_s4 }
  0x1a   :  { %p905_p10 = pnand %p903_p9, %p900_p8 }
  0x1c   :  { %908 = shalt.err (!%p905_p10)
}
  0x1d   :  { %s909_s1 = scalar_lea.vmem %s63_s30, 1024  ;;  %p914_p12 = scmp.lt.s32.totalorder %s63_s30, %s63_s30 }
  0x1e   :  { %p910_p11 = scmp.ne.s32.totalorder %s63_s30, %s909_s1  ;;  %p915_p13 = scmp.lt.s32.totalorder %s909_s1, %s909_s1 }
  0x20   :  { %p916_p0 = por %p915_p13, %p914_p12 }
  0x22   :  { %p917_p1 = pnand %p916_p0, %p910_p11 }
  0x24   :  { %920 = shalt.err (!%p917_p1)
}
  0x25   :  { %s1068_s18 = smov 64   ;;  %s1069_s22 = smov 4  }
  0x26   :  { %68 = dma.hbm_to_vmem [thread:$0]  %s1291_s4, 1024, %s63_s30, [#allocation9], %s1068_s18, %s1068_s18, %s1069_s22  }
  0x27   :  { %s921_s27 = scalar_lea.hbm %s1287_s0, 128 }
  0x28   :  { %p922_p2 = scmp.ne.s32.totalorder %s1287_s0, %s921_s27  ;;  %p925_p3 = scmp.lt.u32.totalorder %s921_s27, %s1287_s0 }
  0x2a   :  { %p927_p4 = pnand %p925_p3, %p922_p2 }
  0x2c   :  { %930 = shalt.err (!%p927_p4)
}
  0x2d   :  { %s931_s15 = scalar_lea.vmem %s30_s13, 128  ;;  %p936_p6 = scmp.lt.s32.totalorder %s30_s13, %s30_s13 }
  0x2e   :  { %p932_p5 = scmp.ne.s32.totalorder %s30_s13, %s931_s15  ;;  %p937_p7 = scmp.lt.s32.totalorder %s931_s15, %s931_s15 }
  0x30   :  { %p938_p8 = por %p937_p7, %p936_p6 }
  0x32   :  { %p939_p9 = pnand %p938_p8, %p932_p5 }
  0x34   :  { %942 = shalt.err (!%p939_p9)
}
  0x35   :  { %32 = dma.hbm_to_vmem [thread:$0]  %s1287_s0, 128, %s30_s13, [#allocation3]  }
  0x36   :  { %s1070_s16 = smov [#allocation7]   ;;  %s1071_s19 = smov [#allocation10]  }
  0x37   :  { %s48_s17 = sshll.u32 %s1070_s16, 4  ;;  %s76_s20 = sshll.u32 %s1071_s19, 4  ;;  %s49_s17 = int_to_ptr.vmem [resolvable:$true] %s48_s17  ;;  %s77_s20 = int_to_ptr.vmem [resolvable:$true] %s76_s20 }
  0x38   :  { %s943_s23 = scalar_lea.hbm %s1289_s2, 2048 }
  0x39   :  { %p944_p10 = scmp.ne.s32.totalorder %s1289_s2, %s943_s23  ;;  %p947_p11 = scmp.lt.u32.totalorder %s943_s23, %s1289_s2 }
  0x3b   :  { %p949_p12 = pnand %p947_p11, %p944_p10 }
  0x3d   :  { %952 = shalt.err (!%p949_p12)
}
  0x3e   :  { %s953_s0 = scalar_lea.vmem %s49_s17, 2048  ;;  %p958_p0 = scmp.lt.s32.totalorder %s49_s17, %s49_s17 }
  0x3f   :  { %p954_p13 = scmp.ne.s32.totalorder %s49_s17, %s953_s0  ;;  %p959_p1 = scmp.lt.s32.totalorder %s953_s0, %s953_s0 }
  0x41   :  { %p960_p2 = por %p959_p1, %p958_p0 }
  0x43   :  { %p961_p3 = pnand %p960_p2, %p954_p13 }
  0x45   :  { %964 = shalt.err (!%p961_p3)
}
  0x46   :  { %54 = dma.hbm_to_vmem [thread:$0]  %s1289_s2, 2048, %s49_s17, [#allocation6], %s1068_s18, %s1068_s18, %s1069_s22  }
  0x47   :  { %s965_s14 = scalar_lea.hbm %s1293_s6, 1024 }
  0x48   :  { %p966_p4 = scmp.ne.s32.totalorder %s1293_s6, %s965_s14  ;;  %p969_p5 = scmp.lt.u32.totalorder %s965_s14, %s1293_s6 }
  0x4a   :  { %p971_p6 = pnand %p969_p5, %p966_p4 }
  0x4c   :  { %974 = shalt.err (!%p971_p6)
}
  0x4d   :  { %s975_s19 = scalar_lea.vmem %s77_s20, 1024  ;;  %p980_p8 = scmp.lt.s32.totalorder %s77_s20, %s77_s20 }
  0x4e   :  { %p976_p7 = scmp.ne.s32.totalorder %s77_s20, %s975_s19  ;;  %p981_p9 = scmp.lt.s32.totalorder %s975_s19, %s975_s19 }
  0x50   :  { %p982_p10 = por %p981_p9, %p980_p8 }
  0x52   :  { %p983_p11 = pnand %p982_p10, %p976_p7 }
  0x54   :  { %986 = shalt.err (!%p983_p11)
}
  0x55   :  { %82 = dma.hbm_to_vmem [thread:$0]  %s1293_s6, 1024, %s77_s20, [#allocation9], %s1068_s18, %s1068_s18, %s1069_s22  }
  0x56   :  { %s1072_s21 = smov [#allocation11]   ;;  %s987_s25 = scalar_lea.hbm %s1295_s8, 1024 }
  0x57   :  { %s90_s1 = sshll.u32 %s1072_s21, 4  ;;  %p988_p12 = scmp.ne.s32.totalorder %s1295_s8, %s987_s25  ;;  %s91_s1 = int_to_ptr.vmem [resolvable:$true] %s90_s1 }
  0x58   :  { %p991_p13 = scmp.lt.u32.totalorder %s987_s25, %s1295_s8 }
  0x5a   :  { %p993_p0 = pnand %p991_p13, %p988_p12 }
  0x5c   :  { %996 = shalt.err (!%p993_p0)
}
  0x5d   :  { %s997_s28 = scalar_lea.vmem %s91_s1, 1024  ;;  %p1002_p2 = scmp.lt.s32.totalorder %s91_s1, %s91_s1 }
  0x5e   :  { %p998_p1 = scmp.ne.s32.totalorder %s91_s1, %s997_s28  ;;  %p1003_p3 = scmp.lt.s32.totalorder %s997_s28, %s997_s28 }
  0x60   :  { %p1004_p4 = por %p1003_p3, %p1002_p2 }
  0x62   :  { %p1005_p5 = pnand %p1004_p4, %p998_p1 }
  0x64   :  { %1008 = shalt.err (!%p1005_p5)
}
  0x65   :  { %96 = dma.hbm_to_vmem [thread:$0]  %s1295_s8, 1024, %s91_s1, [#allocation12], %s1068_s18, %s1068_s18, %s1069_s22  }
  0x66   :  { %1053 = dma.done.wait [#allocation3], 128  }
  0x67   :  { %1054 = vsyncadd [#allocation3], 4294967168 }
  0x68   :  { %1055 = dma.done.wait [#allocation6], 2176  }
  0x69   :  { %1056 = vsyncadd [#allocation6], 4294965120 }
  0x6a   :  { %1057 = dma.done.wait [#allocation9], 2048  }
  0x6b   :  { %1058 = vsyncadd [#allocation9], 4294965248 }
  0x6c   :  { %1059 = dma.done.wait [#allocation12], 1024  }
  0x6d   :  { %1060 = vsyncadd [#allocation12], 4294966272  ;;  %v1073_v0 = vmov 0.0   ;;  %v835_v1 = vld [vmem:[#allocation7 + $0x40] sm:$0xff]   ;;  %v837_v3 = vld [vmem:[#allocation7 + $0x48] sm:$0xff]   ;;  %vm1074_vm0 = vmmov 0  }
  0x6e   :  { %763 = vmatprep.subr.bf16.mxu1 %v1073_v0  ;;  %v836_v2 = vld [vmem:[#allocation7] sm:$0xff]   ;;  %714 = vmatprep.subr.bf16.mxu0 %v835_v1  ;;  %v838_v4 = vld [vmem:[#allocation7 + $0x8] sm:$0xff]   ;;  %v839_v5 = vld [vmem:[#allocation7 + $0x50] sm:$0xff]  }
  0x6f   :  { %715 = vmatpush3.bf16.msra.mxu0 %v836_v2  ;;  %v840_v6 = vld [vmem:[#allocation7 + $0x10] sm:$0xff]   ;;  %v841_v7 = vld [vmem:[#allocation7 + $0x58] sm:$0xff]   ;;  %v843_v9 = vld [vmem:[#allocation7 + $0x60] sm:$0xff]   ;;  %779 = vmatprep.mubr.msk.bf16.mxu1 %vm1074_vm0, %v1073_v0 }
  0x70   :  { %716 = vmatprep.subr.bf16.mxu0 %v837_v3  ;;  %v842_v8 = vld [vmem:[#allocation7 + $0x18] sm:$0xff]   ;;  %v844_v10 = vld [vmem:[#allocation7 + $0x20] sm:$0xff]   ;;  %v845_v11 = vld [vmem:[#allocation7 + $0x68] sm:$0xff]  }
  0x71   :  { %v119_v12 = vld [vmem:[#allocation5] sm:$0xff]  ;;  %v846_v13 = vld [vmem:[#allocation7 + $0x28] sm:$0xff]   ;;  %v851_v15 = vld [vmem:[#allocation8] sm:$0xff]  }
  0x72   :  { %v121_v14 = vpack.c.bf16 %v119_v12, %v119_v12  ;;  %v847_v16 = vld [vmem:[#allocation7 + $0x70] sm:$0xff]   ;;  %v852_v17 = vld [vmem:[#allocation8 + $0x8] sm:$0xff]   ;;  %764 = vmatpush3.bf16.msra.mxu1 %v851_v15  ;;  %v849_v19 = vld [vmem:[#allocation7 + $0x78] sm:$0xff]  }
  0x73   :  { %717 = vmatpush3.bf16.msra.mxu0 %v838_v4  ;;  %v848_v18 = vld [vmem:[#allocation7 + $0x30] sm:$0xff]   ;;  %765 = vmatprep.subr.bf16.mxu1 %v1073_v0  ;;  %v850_v21 = vld [vmem:[#allocation7 + $0x38] sm:$0xff]   ;;  %v855_v25 = vld [vmem:[#allocation8 + $0x20] sm:$0xff]  }
  0x74   :  { %718 = vmatprep.subr.bf16.mxu0 %v839_v5  ;;  %289 = vmatprep.mubr.bf16.mxu0 %v121_v14  ;;  %v853_v20 = vld [vmem:[#allocation8 + $0x10] sm:$0xff]   ;;  %v854_v24 = vld [vmem:[#allocation8 + $0x18] sm:$0xff]   ;;  %v856_v26 = vld [vmem:[#allocation8 + $0x28] sm:$0xff]  }
  0x75   :  { %v118_v22 = vld [vmem:[#allocation2] sm:$0xff]  ;;  %v858_v28 = vld [vmem:[#allocation8 + $0x38] sm:$0xff]   ;;  %v859_v29 = vld [vmem:[#allocation10] sm:$0xff]  }
  0x76   :  { %766 = vmatpush3.bf16.msra.mxu1 %v852_v17  ;;  %v120_v23 = vpack.c.bf16 %v118_v22, %v118_v22  ;;  %v857_v27 = vld [vmem:[#allocation8 + $0x30] sm:$0xff]   ;;  %v860_v30 = vld [vmem:[#allocation10 + $0x8] sm:$0xff]   ;;  %v862_v32 = vld [vmem:[#allocation10 + $0x18] sm:$0xff]  }
  0x77   :  { %719 = vmatpush3.bf16.msra.mxu0 %v840_v6  ;;  %767 = vmatprep.subr.bf16.mxu1 %v1073_v0  ;;  %v861_v31 = vld [vmem:[#allocation10 + $0x10] sm:$0xff]   ;;  %v863_v33 = vld [vmem:[#allocation10 + $0x20] sm:$0xff]   ;;  %v864_v34 = vld [vmem:[#allocation10 + $0x28] sm:$0xff]  }
  0x78   :  { %720 = vmatprep.subr.bf16.mxu0 %v841_v7  ;;  %v670_v36 = vld [vmem:[%s1290_s3] ss:$0 sm:$0xff]  ;;  %v866_v45 = vld [vmem:[#allocation10 + $0x38] sm:$0xff]   ;;  %v867_v46 = vld [vmem:[#allocation11] sm:$0xff]  }
  0x79   :  { %v865_v44 = vld [vmem:[#allocation10 + $0x30] sm:$0xff]   ;;  %v868_v47 = vld [vmem:[#allocation11 + $0x8] sm:$0xff]   ;;  %v870_v49 = vld [vmem:[#allocation11 + $0x18] sm:$0xff]  }
  0x7a   :  { %768 = vmatpush3.bf16.msra.mxu1 %v853_v20  ;;  %v869_v48 = vld [vmem:[#allocation11 + $0x10] sm:$0xff]   ;;  %v871_v50 = vld [vmem:[#allocation11 + $0x20] sm:$0xff]   ;;  %v872_v51 = vld [vmem:[#allocation11 + $0x28] sm:$0xff]  }
  0x7b   :  { %721 = vmatpush3.bf16.msra.mxu0 %v842_v8  ;;  %769 = vmatprep.subr.bf16.mxu1 %v1073_v0  ;;  %v687_v52 = vld [vmem:[%s1292_s5] ss:$0 sm:$0xff]  ;;  %v874_v61 = vld [vmem:[#allocation11 + $0x38] sm:$0xff]   ;;  %s1075_s5 = smov [#allocation14]  }
  0x7c   :  { %722 = vmatprep.subr.bf16.mxu0 %v843_v9  ;;  %v873_v60 = vld [vmem:[#allocation11 + $0x30] sm:$0xff]   ;;  %s654_s14 = sshll.u32 %s1075_s5, 4  ;;  %s655_s14 = int_to_ptr.vmem [resolvable:$true] %s654_s14 }
  0x7d   :  { %v696_v62 = vld [vmem:[%s1294_s7] ss:$0 sm:$0xff]  ;;  %s1009_s15 = scalar_lea.vmem %s655_s14, 128  ;;  %p1014_p7 = scmp.lt.s32.totalorder %s655_s14, %s655_s14 }
  0x7e   :  { %770 = vmatpush3.bf16.msra.mxu1 %v854_v24  ;;  %p1010_p6 = scmp.ne.s32.totalorder %s655_s14, %s1009_s15  ;;  %p1015_p8 = scmp.lt.s32.totalorder %s1009_s15, %s1009_s15 }
  0x7f   :  { %723 = vmatpush3.bf16.msra.mxu0 %v844_v10  ;;  %771 = vmatprep.subr.bf16.mxu1 %v1073_v0 }
  0x80   :  { %724 = vmatprep.subr.bf16.mxu0 %v845_v11  ;;  %p1016_p9 = por %p1015_p8, %p1014_p7 }
  0x82   :  { %772 = vmatpush3.bf16.msra.mxu1 %v855_v25  ;;  %p1017_p10 = pnand %p1016_p9, %p1010_p6 }
  0x83   :  { %725 = vmatpush3.bf16.msra.mxu0 %v846_v13  ;;  %773 = vmatprep.subr.bf16.mxu1 %v1073_v0 }
  0x84   :  { %726 = vmatprep.subr.bf16.mxu0 %v847_v16 }
  0x86   :  { %774 = vmatpush3.bf16.msra.mxu1 %v856_v26 }
  0x87   :  { %727 = vmatpush3.bf16.msra.mxu0 %v848_v18  ;;  %775 = vmatprep.subr.bf16.mxu1 %v1073_v0 }
  0x88   :  { %728 = vmatprep.subr.bf16.mxu0 %v849_v19 }
  0x8a   :  { %776 = vmatpush3.bf16.msra.mxu1 %v857_v27 }
  0x8b   :  { %729 = vmatpush3.bf16.msra.mxu0 %v850_v21  ;;  %777 = vmatprep.subr.bf16.mxu1 %v1073_v0 }
  0x8c   :  { %783 = vmatprep.subr.bf16.mxu0 %v1073_v0 }
  0x8e   :  { %290 = vmatmul.mubr.bf16.vlgmr.msra.gmra.mrb[0].mxu0 %v120_v23  ;;  %778 = vmatpush3.bf16.msra.mxu1 %v858_v28 }
  0x8f   :  { %803 = vmatprep.subr.bf16.mxu1 %v1073_v0  ;;  %799 = vmatprep.mubr.msk.bf16.mxu0 %vm1074_vm0, %v1073_v0 }
  0x90   :  { %784 = vmatpush3.bf16.msra.mxu0 %v859_v29 }
  0x91   :  { %785 = vmatprep.subr.bf16.mxu0 %v1073_v0 }
  0x94   :  { %786 = vmatpush3.bf16.msra.mxu0 %v860_v30 }
  0x95   :  { %787 = vmatprep.subr.bf16.mxu0 %v1073_v0 }
  0x98   :  { %788 = vmatpush3.bf16.msra.mxu0 %v861_v31 }
  0x99   :  { %789 = vmatprep.subr.bf16.mxu0 %v1073_v0 }
  0x9c   :  { %790 = vmatpush3.bf16.msra.mxu0 %v862_v32 }
  0x9d   :  { %791 = vmatprep.subr.bf16.mxu0 %v1073_v0 }
  0xa0   :  { %792 = vmatpush3.bf16.msra.mxu0 %v863_v33 }
  0xa1   :  { %793 = vmatprep.subr.bf16.mxu0 %v1073_v0 }
  0xa4   :  { %794 = vmatpush3.bf16.msra.mxu0 %v864_v34 }
  0xa5   :  { %795 = vmatprep.subr.bf16.mxu0 %v1073_v0 }
  0xa8   :  { %796 = vmatpush3.bf16.msra.mxu0 %v865_v44 }
  0xa9   :  { %797 = vmatprep.subr.bf16.mxu0 %v1073_v0 }
  0xac   :  { %798 = vmatpush3.bf16.msra.mxu0 %v866_v45 }
 0x161   :  { %v730_v35 = vpop.f32.mrb[0].mxu0 }
 0x162   :  { %v731_v37 = vpop.f32.mrb[1].mxu0 }
 0x163   :  { %v732_v38 = vadd.f32 %v731_v37, %v730_v35  ;;  %v733_v39 = vpop.f32.mrb[2].mxu0 }
 0x164   :  { %v734_v40 = vpop.f32.mrb[3].mxu0 }
 0x165   :  { %v292_v41 = vadd.f32 %v732_v38, %v670_v36 }
 0x167   :  { %875 = vtanh.f32 %v292_v41 }
 0x171   :  { %v876_v42 = vpop.eup %875 }
 0x172   :  { %637 = vst [vmem:[#allocation14] sm:$0xff] %v876_v42  ;;  %v298_v43 = vpack.c.bf16 %v876_v42, %v876_v42 }
 0x174   :  { %780 = vmatmul.mubr.bf16.vlgmr.msra.gmra.mrb[0].mxu1 %v298_v43 }
 0x175   :  { %819 = vmatprep.mubr.msk.bf16.mxu1 %vm1074_vm0, %v1073_v0  ;;  %804 = vmatpush3.bf16.msra.mxu1 %v867_v46 }
 0x176   :  { %805 = vmatprep.subr.bf16.mxu1 %v1073_v0 }
 0x179   :  { %806 = vmatpush3.bf16.msra.mxu1 %v868_v47 }
 0x17a   :  { %807 = vmatprep.subr.bf16.mxu1 %v1073_v0 }
 0x17d   :  { %808 = vmatpush3.bf16.msra.mxu1 %v869_v48 }
 0x17e   :  { %809 = vmatprep.subr.bf16.mxu1 %v1073_v0 }
 0x181   :  { %810 = vmatpush3.bf16.msra.mxu1 %v870_v49 }
 0x182   :  { %811 = vmatprep.subr.bf16.mxu1 %v1073_v0 }
 0x185   :  { %812 = vmatpush3.bf16.msra.mxu1 %v871_v50 }
 0x186   :  { %813 = vmatprep.subr.bf16.mxu1 %v1073_v0 }
 0x189   :  { %814 = vmatpush3.bf16.msra.mxu1 %v872_v51 }
 0x18a   :  { %815 = vmatprep.subr.bf16.mxu1 %v1073_v0 }
 0x18d   :  { %816 = vmatpush3.bf16.msra.mxu1 %v873_v60 }
 0x18e   :  { %817 = vmatprep.subr.bf16.mxu1 %v1073_v0 }
 0x191   :  { %818 = vmatpush3.bf16.msra.mxu1 %v874_v61 }
 0x247   :  { %v404_v53 = vpop.f32.mrb[0].mxu1 }
 0x248   :  { %v405_v54 = vadd.f32 %v687_v52, %v404_v53  ;;  %v781_v55 = vpop.f32.mrb[1].mxu1 }
 0x249   :  { %v407_v56 = vpop.f32.mrb[2].mxu1 }
 0x24a   :  { %v410_v57 = vmax.f32 %v405_v54, 0.0  ;;  %v782_v58 = vpop.f32.mrb[3].mxu1 }
 0x24c   :  { %v411_v59 = vpack.c.bf16 %v410_v57, %v410_v57 }
 0x24e   :  { %800 = vmatmul.mubr.bf16.vlgmr.msra.gmra.mrb[4].mxu0 %v411_v59 }
 0x321   :  { %v517_v63 = vpop.f32.mrb[4].mxu0 }
 0x322   :  { %v518_v1 = vadd.f32 %v696_v62, %v517_v63  ;;  %v801_v2 = vpop.f32.mrb[5].mxu0 }
 0x323   :  { %v520_v3 = vpop.f32.mrb[6].mxu0 }
 0x324   :  { %v523_v4 = vmax.f32 %v518_v1, 0.0  ;;  %v802_v5 = vpop.f32.mrb[7].mxu0 }
 0x326   :  { %v524_v6 = vpack.c.bf16 %v523_v4, %v523_v4 }
 0x328   :  { %820 = vmatmul.mubr.bf16.vlgmr.msra.gmra.mrb[4].mxu1 %v524_v6 }
 0x329   :  { %1020 = shalt.err (!%p1017_p10)
}
 0x32a   :  { %s1021_s30 = scalar_lea.hbm %s1298_s11, 128 }
 0x32b   :  { %p1022_p11 = scmp.ne.s32.totalorder %s1298_s11, %s1021_s30  ;;  %p1025_p12 = scmp.lt.u32.totalorder %s1021_s30, %s1298_s11 }
 0x32d   :  { %p1027_p13 = pnand %p1025_p12, %p1022_p11 }
 0x32f   :  { %1030 = shalt.err (!%p1027_p13)
}
 0x330   :  { %657 = dma.vmem_to_hbm [thread:$0]  %s655_s14, 128, %s1298_s11, [#allocation15]   ;;  %v705_v0 = vld [vmem:[%s1296_s9] ss:$0 sm:$0xff] }
 0x331   :  { %s1076_s25 = smov [#allocation13]  }
 0x332   :  { %s644_s26 = sshll.u32 %s1076_s25, 4  ;;  %s645_s26 = int_to_ptr.vmem [resolvable:$true] %s644_s26 }
 0x333   :  { %s1031_s27 = scalar_lea.vmem %s645_s26, 128  ;;  %p1036_p1 = scmp.lt.s32.totalorder %s645_s26, %s645_s26 }
 0x334   :  { %p1032_p0 = scmp.ne.s32.totalorder %s645_s26, %s1031_s27  ;;  %p1037_p2 = scmp.lt.s32.totalorder %s1031_s27, %s1031_s27 }
 0x336   :  { %p1038_p3 = por %p1037_p2, %p1036_p1 }
 0x338   :  { %p1039_p4 = pnand %p1038_p3, %p1032_p0 }
 0x3fb   :  { %v630_v7 = vpop.f32.mrb[4].mxu1 }
 0x3fc   :  { %v631_v8 = vadd.f32 %v705_v0, %v630_v7  ;;  %v821_v9 = vpop.f32.mrb[5].mxu1 }
 0x3fd   :  { %v633_v10 = vpop.f32.mrb[6].mxu1 }
 0x3fe   :  { %636 = vst [vmem:[#allocation13] sm:$0xff] %v631_v8  ;;  %v822_v11 = vpop.f32.mrb[7].mxu1 }
 0x3ff   :  { %1042 = shalt.err (!%p1039_p4)
}
 0x400   :  { %s1043_s9 = scalar_lea.hbm %s1297_s10, 128 }
 0x401   :  { %p1044_p5 = scmp.ne.s32.totalorder %s1297_s10, %s1043_s9  ;;  %p1047_p6 = scmp.lt.u32.totalorder %s1043_s9, %s1297_s10 }
 0x403   :  { %p1049_p7 = pnand %p1047_p6, %p1044_p5 }
 0x405   :  { %1052 = shalt.err (!%p1049_p7)
}
 0x406   :  { %647 = dma.vmem_to_hbm [thread:$0]  %s645_s26, 128, %s1297_s10, [#allocation4]  }
 0x407   :  { %1061 = dma.done.wait [#allocation4], 128  }
 0x408   :  { %1062 = vsyncadd [#allocation4], 4294967168 }
 0x409   :  { %1063 = dma.done.wait [#allocation15], 128  }
 0x40a   :  { %1064 = vsyncadd [#allocation15], 4294967168 }
 0x40b   :  { %664 = vsyncpa [#allocation3], 1 }
 0x40c   :  { %665 = vsyncpa [#allocation6], 1 }
 0x40d   :  { %666 = vsyncpa [#allocation9], 1 }
 0x40e   :  { %667 = vsyncpa [#allocation12], 1 }
 0x40f   :  { %668 = vsyncpa [#allocation4], 1 }
 0x410   :  { %669 = vsyncpa [#allocation15], 1 }

</bundles_post_ra>
